<compile_context>
chip_gen: v5e
topology: v5e:2x2
jax: 0.10.0
libtpu: 0.0.40
codegen_flags: <defaults>
</compile_context>

<pallas_src>
import functools

import jax
import jax.numpy as jnp
from jax import lax
from jax.experimental import pallas as pl
from jax.experimental.pallas import tpu as pltpu


def _round_up(a: int, b: int) -> int:
    return (a + b - 1) // b * b


def _ffn_kernel(seed_ref, x_ref, w1_ref, b1_ref, w2_ref, b2_ref, o_ref, *,
                dropout_prob: float, training: bool, tm: int, ncols: int):
    """One (TM, E) row-tile of: dense1 -> ReLU -> dense2 -> dropout."""
    # dense1: (TM, E) @ (E, 4E) -> f32 accumulator (MXU, bf16 operands).
    x = x_ref[...].astype(jnp.bfloat16)
    h = jnp.dot(x, w1_ref[...], preferred_element_type=jnp.float32) + b1_ref[...]
    # ReLU (VPU); downcast so the second matmul also runs at full bf16 MXU rate
    # and the (TM, 4E) hidden working set is halved.
    h = jnp.maximum(h, 0.0).astype(jnp.bfloat16)
    # dense2: (TM, 4E) @ (4E, E) -> f32 accumulator.
    y = jnp.dot(h, w2_ref[...], preferred_element_type=jnp.float32) + b2_ref[...]

    if training and dropout_prob > 0.0:
        # Counter-based hash PRNG: unique per (seed, global element index), so every
        # grid tile gets an independent mask.  Pure 32-bit VPU integer ops, so it
        # also runs under the TPU interpreter (pltpu.prng_seed does not).
        pid = pl.program_id(0).astype(jnp.uint32)
        rows = lax.broadcasted_iota(jnp.int32, y.shape, 0).astype(jnp.uint32)
        cols = lax.broadcasted_iota(jnp.int32, y.shape, 1).astype(jnp.uint32)
        gidx = (pid * jnp.uint32(tm) + rows) * jnp.uint32(ncols) + cols
        z = gidx ^ (seed_ref[0].astype(jnp.uint32) * jnp.uint32(0x9E3779B9))
        z = (z ^ (z >> jnp.uint32(16))) * jnp.uint32(0x7FEB352D)
        z = (z ^ (z >> jnp.uint32(15))) * jnp.uint32(0x846CA68B)
        z = z ^ (z >> jnp.uint32(16))
        threshold = jnp.uint32(min(int(dropout_prob * (2 ** 32)), 2 ** 32 - 1))
        keep = z >= threshold
        y = jnp.where(keep, y * (1.0 / (1.0 - dropout_prob)), 0.0)

    o_ref[...] = y.astype(o_ref.dtype)


def init_ffn_params(key, embedding_size: int, dtype=jnp.float32):
    """Deterministic init matching nn.Linear defaults: U(-1/sqrt(fan_in), 1/sqrt(fan_in))."""
    e = embedding_size
    h = 4 * e
    k1, k2, k3, k4 = jax.random.split(key, 4)
    bnd1 = 1.0 / (e ** 0.5)
    bnd2 = 1.0 / (h ** 0.5)
    w1 = jax.random.uniform(k1, (e, h), dtype, -bnd1, bnd1)   # dense1 weight, (in, out)
    b1 = jax.random.uniform(k2, (1, h), dtype, -bnd1, bnd1)   # dense1 bias
    w2 = jax.random.uniform(k3, (h, e), dtype, -bnd2, bnd2)   # dense2 weight, (in, out)
    b2 = jax.random.uniform(k4, (1, e), dtype, -bnd2, bnd2)   # dense2 bias
    return w1, b1, w2, b2


def feed_forward_network(x, params, *, dropout_prob: float = 0.1,
                         training: bool = False, seed: int = 0, tm=None):
    """Pallas FFN forward. x: (batch, seq, E). Returns same shape/dtype."""
    b, s, e = x.shape
    h4 = 4 * e
    m = b * s
    w1, b1, w2, b2 = params

    # Row-tile size: multiple of 8 sublanes; 512 is the measured sweet spot for
    # large M (sweep 256/512/1024; prefer 128/256 on v5e).
    if tm is None:
        tm = 512 if m >= 512 else _round_up(m, 8)
    m_pad = _round_up(m, tm)

    x2 = x.reshape(m, e)
    if m_pad != m:
        x2 = jnp.pad(x2, ((0, m_pad - m), (0, 0)))

    # Weights feed the MXU as bf16 (f32 accumulation in-kernel); biases stay f32.
    w1b = w1.astype(jnp.bfloat16)
    w2b = w2.astype(jnp.bfloat16)
    b1f = b1.astype(jnp.float32)
    b2f = b2.astype(jnp.float32)

    kernel = functools.partial(_ffn_kernel, dropout_prob=float(dropout_prob),
                               training=bool(training), tm=tm, ncols=e)

    grid = (m_pad // tm,)

    # VMEM budget: resident weights + double-buffered x/out tiles + hidden working set.
    itemsize = jnp.dtype(x.dtype).itemsize
    need = 2 * (e * h4) * 2 + (h4 + e) * 4            # bf16 w1+w2, f32 biases
    need += 2 * tm * e * (itemsize + itemsize)        # 2x-buffered x and out tiles
    need += tm * h4 * (4 + 2)                         # f32 acc + bf16 hidden
    vmem_limit = min(64 << 20, max(32 << 20, (need * 3) // 2))

    flops = 4 * m_pad * e * h4                        # two matmuls
    bytes_accessed = 2 * (m_pad * e * itemsize) + 2 * (e * h4) * 2 + (h4 + e) * 4

    out2 = pl.pallas_call(
        kernel,
        out_shape=jax.ShapeDtypeStruct((m_pad, e), x.dtype),
        grid=grid,
        in_specs=[
            pl.BlockSpec(memory_space=pltpu.MemorySpace.SMEM),    # seed (1,)
            pl.BlockSpec((tm, e), lambda i: (i, 0)),              # x row tile
            pl.BlockSpec((e, h4), lambda i: (0, 0)),              # w1 (VMEM-resident)
            pl.BlockSpec((1, h4), lambda i: (0, 0)),              # b1 (VMEM-resident)
            pl.BlockSpec((h4, e), lambda i: (0, 0)),              # w2 (VMEM-resident)
            pl.BlockSpec((1, e), lambda i: (0, 0)),               # b2 (VMEM-resident)
        ],
        out_specs=pl.BlockSpec((tm, e), lambda i: (i, 0)),
        compiler_params=pltpu.CompilerParams(
            dimension_semantics=("parallel",),
            vmem_limit_bytes=int(vmem_limit)),
        cost_estimate=pl.CostEstimate(flops=flops, transcendentals=0,
                                      bytes_accessed=bytes_accessed),
    )(jnp.asarray([seed], dtype=jnp.int32), x2, w1b, b1f, w2b, b2f)

    if m_pad != m:
        out2 = out2[:m]
    return out2.reshape(b, s, e)


def _reference_ffn_f32(x, params):
    """Pure-JAX f32 reference (eval mode, dropout = identity)."""
    w1, b1, w2, b2 = params
    h = jnp.maximum(x @ w1 + b1[0], 0.0)
    return h @ w2 + b2[0]


def _reference_ffn_bf16(x, params):
    """Mirrors the kernel's bf16-operand / f32-accumulate numerics (eval mode)."""
    w1, b1, w2, b2 = params
    xb = x.astype(jnp.bfloat16)
    h = jnp.dot(xb, w1.astype(jnp.bfloat16),
                preferred_element_type=jnp.float32) + b1[0]
    h = jnp.maximum(h, 0.0).astype(jnp.bfloat16)
    return jnp.dot(h, w2.astype(jnp.bfloat16),
                   preferred_element_type=jnp.float32) + b2[0]


if __name__ == "__main__":
    batch, seq, embedding_size = 2, 8, 32
    dropout_prob = 0.1

    key = jax.random.PRNGKey(0)
    kx, kp = jax.random.split(key)
    x = jax.random.normal(kx, (batch, seq, embedding_size), dtype=jnp.float32)
    params = init_ffn_params(kp, embedding_size)

    # Eval-mode forward (dropout is identity, matching module.eval()).
    out = feed_forward_network(x, params, dropout_prob=dropout_prob, training=False)
    out = jax.block_until_ready(out)
    assert out.shape == x.shape and out.dtype == x.dtype

    ref_bf16 = _reference_ffn_bf16(x, params)
    ref_f32 = _reference_ffn_f32(x, params)
    assert jnp.allclose(out, ref_bf16, atol=5e-3, rtol=5e-3), "mismatch vs bf16 reference"
    assert jnp.allclose(out, ref_f32, atol=6e-2, rtol=6e-2), "mismatch vs f32 reference"

    # Training-mode forward exercises the in-kernel dropout path.
    out_train = feed_forward_network(x, params, dropout_prob=dropout_prob,
                                     training=True, seed=1234)
    out_train = jax.block_until_ready(out_train)
    assert out_train.shape == x.shape
    drop_frac = float(jnp.mean(out_train == 0.0))
    assert 0.0 < drop_frac < 0.5, f"unexpected dropout fraction {drop_frac}"
    # Kept elements are exactly the eval output scaled by 1/(1-p).
    kept_train = jnp.where(out_train == 0.0, 0.0, out_train)
    kept_ref = jnp.where(out_train == 0.0, 0.0, out / (1.0 - dropout_prob))
    assert jnp.allclose(kept_train, kept_ref, atol=1e-5, rtol=1e-5)

    print("KERNEL_OK")
</pallas_src>

<mosaic_0001>
module attributes {stable_mosaic.version = 11 : i64} {
  func.func @_ffn_kernel(%arg0: i32, %arg1: memref<1xi32, #tpu.memory_space<smem>>, %arg2: memref<16x32xf32, #tpu.memory_space<vmem>>, %arg3: memref<32x128xbf16, #tpu.memory_space<vmem>>, %arg4: memref<1x128xf32, #tpu.memory_space<vmem>>, %arg5: memref<128x32xbf16, #tpu.memory_space<vmem>>, %arg6: memref<1x32xf32, #tpu.memory_space<vmem>>, %arg7: memref<16x32xf32, #tpu.memory_space<vmem>>) attributes {dimension_semantics = [#tpu.dimension_semantics<parallel>], iteration_bounds = array<i64: 1>, scalar_prefetch = 0 : i64, scratch_operands = 0 : i64, tpu.core_type = #tpu.core_type<tc>, window_params = [{transform_indices = @transform_0, window_bounds = array<i64: 1>}, {transform_indices = @transform_1, window_bounds = array<i64: 16, 32>}, {pipeline_mode = #tpu.pipeline_mode<synchronous>, transform_indices = @transform_2, window_bounds = array<i64: 32, 128>}, {pipeline_mode = #tpu.pipeline_mode<synchronous>, transform_indices = @transform_3, window_bounds = array<i64: 1, 128>}, {pipeline_mode = #tpu.pipeline_mode<synchronous>, transform_indices = @transform_4, window_bounds = array<i64: 128, 32>}, {pipeline_mode = #tpu.pipeline_mode<synchronous>, transform_indices = @transform_5, window_bounds = array<i64: 1, 32>}, {transform_indices = @transform_6, window_bounds = array<i64: 16, 32>}]} {
    %c0 = arith.constant 0 : index
    %c0_0 = arith.constant 0 : index
    %0 = vector.load %arg2[%c0, %c0_0] : memref<16x32xf32, #tpu.memory_space<vmem>>, vector<16x32xf32>
    %1 = arith.truncf %0 : vector<16x32xf32> to vector<16x32xbf16>
    %c0_1 = arith.constant 0 : index
    %c0_2 = arith.constant 0 : index
    %2 = vector.load %arg3[%c0_1, %c0_2] : memref<32x128xbf16, #tpu.memory_space<vmem>>, vector<32x128xbf16>
    %cst = arith.constant dense<0.000000e+00> : vector<16x128xf32>
    %3 = tpu.matmul %1, %2, %cst {dimension_numbers = #tpu.dot_dimension_numbers<[1], [0], [0], [1], [0, 0, 1, 1], [], []>} : vector<16x32xbf16>, vector<32x128xbf16>, vector<16x128xf32> -> vector<16x128xf32>
    %c0_3 = arith.constant 0 : index
    %c0_4 = arith.constant 0 : index
    %4 = vector.load %arg4[%c0_3, %c0_4] : memref<1x128xf32, #tpu.memory_space<vmem>>, vector<1x128xf32>
    %5 = vector.broadcast %4 : vector<1x128xf32> to vector<16x128xf32>
    %6 = arith.addf %3, %5 : vector<16x128xf32>
    %cst_5 = arith.constant 0.000000e+00 : f32
    %7 = vector.broadcast %cst_5 : f32 to vector<16x128xf32>
    %8 = arith.maximumf %6, %7 : vector<16x128xf32>
    %9 = arith.truncf %8 : vector<16x128xf32> to vector<16x128xbf16>
    %c0_6 = arith.constant 0 : index
    %c0_7 = arith.constant 0 : index
    %10 = vector.load %arg5[%c0_6, %c0_7] : memref<128x32xbf16, #tpu.memory_space<vmem>>, vector<128x32xbf16>
    %cst_8 = arith.constant dense<0.000000e+00> : vector<16x32xf32>
    %11 = tpu.matmul %9, %10, %cst_8 {dimension_numbers = #tpu.dot_dimension_numbers<[1], [0], [0], [1], [0, 0, 1, 1], [], []>} : vector<16x128xbf16>, vector<128x32xbf16>, vector<16x32xf32> -> vector<16x32xf32>
    %c0_9 = arith.constant 0 : index
    %c0_10 = arith.constant 0 : index
    %12 = vector.load %arg6[%c0_9, %c0_10] : memref<1x32xf32, #tpu.memory_space<vmem>>, vector<1x32xf32>
    %13 = vector.broadcast %12 : vector<1x32xf32> to vector<16x32xf32>
    %14 = arith.addf %11, %13 : vector<16x32xf32>
    %c0_11 = arith.constant 0 : index
    %c0_12 = arith.constant 0 : index
    %15 = vector.load %arg7[%c0_11, %c0_12] : memref<16x32xf32, #tpu.memory_space<vmem>>, vector<16x32xf32>
    tpu.vector_store %arg7[%c0_11, %c0_12], %14 {strides = array<i32>} : memref<16x32xf32, #tpu.memory_space<vmem>>, vector<16x32xf32>,
    return
  }
  func.func @transform_0(%arg0: i32) -> i32 {
    %c0_i32 = arith.constant 0 : i32
    %c0_i32_0 = arith.constant 0 : i32
    return %c0_i32 : i32
  }
  func.func @transform_1(%arg0: i32) -> (i32, i32) {
    %c0_i32 = arith.constant 0 : i32
    %c0_i32_0 = arith.constant 0 : i32
    return %arg0, %c0_i32 : i32, i32
  }
  func.func @transform_2(%arg0: i32) -> (i32, i32) {
    %c0_i32 = arith.constant 0 : i32
    %c0_i32_0 = arith.constant 0 : i32
    %c0_i32_1 = arith.constant 0 : i32
    return %c0_i32, %c0_i32_0 : i32, i32
  }
  func.func @transform_3(%arg0: i32) -> (i32, i32) {
    %c0_i32 = arith.constant 0 : i32
    %c0_i32_0 = arith.constant 0 : i32
    %c0_i32_1 = arith.constant 0 : i32
    return %c0_i32, %c0_i32_0 : i32, i32
  }
  func.func @transform_4(%arg0: i32) -> (i32, i32) {
    %c0_i32 = arith.constant 0 : i32
    %c0_i32_0 = arith.constant 0 : i32
    %c0_i32_1 = arith.constant 0 : i32
    return %c0_i32, %c0_i32_0 : i32, i32
  }
  func.func @transform_5(%arg0: i32) -> (i32, i32) {
    %c0_i32 = arith.constant 0 : i32
    %c0_i32_0 = arith.constant 0 : i32
    %c0_i32_1 = arith.constant 0 : i32
    return %c0_i32, %c0_i32_0 : i32, i32
  }
  func.func @transform_6(%arg0: i32) -> (i32, i32) {
    %c0_i32 = arith.constant 0 : i32
    %c0_i32_0 = arith.constant 0 : i32
    return %arg0, %c0_i32 : i32, i32
  }
}

</mosaic_0001>

<bundles_post_ra>
// kernel: tpu_custom_call.1
= control target key start
LH: loop header
LB: loop body
LE: loop exit
PB: predicated region body
PF: predicated region fallthrough
CT: control target
= control target key end

     0   :  { %s340_s0 = inlined_call_operand.<no memory space> [shape: s32[1], index: 0, kind: input, shape index: {}]   ;;  %s341_s1 = inlined_call_operand.vmem [shape: f32[16,32], index: 1, kind: input, shape index: {}]   ;;  %s342_s2 = inlined_call_operand.vmem [shape: bf16[32,128], index: 2, kind: input, shape index: {}]   ;;  %s343_s3 = inlined_call_operand.vmem [shape: f32[1,128], index: 3, kind: input, shape index: {}]   ;;  %s344_s4 = inlined_call_operand.vmem [shape: bf16[128,32], index: 4, kind: input, shape index: {}]   ;;  %s345_s5 = inlined_call_operand.vmem [shape: f32[1,32], index: 5, kind: input, shape index: {}]   ;;  %s346_s6 = inlined_call_operand.hbm [shape: f32[16,32], index: 6, kind: output, shape index: {}]  }
   0x1   :  { %v214_v0 = vld [vmem:[%s342_s2 + $0x8] sm:$0xff]  ;;  %v213_v1 = vld [vmem:[%s342_s2] sm:$0xff]  ;;  %v222_v2 = vld [vmem:[%s344_s4 + $0x38] sm:$0xff] }
   0x2   :  { %59 = vmatpush.bf16.msra.mxu0 %v214_v0  ;;  %v26_v3 = vld [vmem:[%s341_s1] sm:$0xff]  ;;  %v27_v4 = vld [vmem:[%s341_s1 + $0x8] sm:$0xff]  ;;  %138 = vmatpush.bf16.msra.mxu1 %v222_v2  ;;  %v221_v5 = vld [vmem:[%s344_s4 + $0x30] sm:$0xff] }
   0x3   :  { %12 = vsyncpa [#allocation4], 0  ;;  %v28_v6 = vpack.c.bf16 %v27_v4, %v26_v3  ;;  %vm49_vm0 = vcmask 261120   ;;  %v220_v7 = vld [vmem:[%s344_s4 + $0x28] sm:$0xff]  ;;  %v219_v8 = vld [vmem:[%s344_s4 + $0x20] sm:$0xff]  ;;  %s255_s24 = smov 128  }
   0x4   :  { %v218_v9 = vld [vmem:[%s344_s4 + $0x18] sm:$0xff]  ;;  %v217_v10 = vld [vmem:[%s344_s4 + $0x10] sm:$0xff]  ;;  %v216_v11 = vld [vmem:[%s344_s4 + $0x8] sm:$0xff]  ;;  %s256_s25 = smov 8  }
   0x5   :  { %v215_v12 = vld [vmem:[%s344_s4] sm:$0xff]  ;;  %s254_s4 = smov [#allocation3]  }
   0x6   :  { %60 = vmatpush.bf16.msra.mxu0 %v213_v1  ;;  %139 = vmatpush.bf16.msra.mxu1 %v221_v5  ;;  %v226_v14 = vld [vmem:[%s343_s3] ss:$0 sm:$0xff]  ;;  %s158_s0 = sshll.u32 %s254_s4, 4  ;;  %s160_s3 = sshll.u32 %s346_s6, 4  ;;  %s159_s0 = int_to_ptr.vmem [resolvable:$true] %s158_s0  ;;  %s161_s3 = int_to_ptr.hbm [resolvable:$true] %s160_s3 }
   0x7   :  { %v227_v21 = vld [vmem:[%s345_s5] ss:$0 sm:$0xff] }
   0x9   :  { %180 = vmatmul.msk.bf16.vlgmr.msra.gmra.mxu0 %vm49_vm0, %v28_v6 }
   0xa   :  { %140 = vmatpush.bf16.msra.mxu1 %v220_v7 }
   0xe   :  { %141 = vmatpush.bf16.msra.mxu1 %v219_v8 }
  0x12   :  { %142 = vmatpush.bf16.msra.mxu1 %v218_v9 }
  0x16   :  { %143 = vmatpush.bf16.msra.mxu1 %v217_v10 }
  0x1a   :  { %144 = vmatpush.bf16.msra.mxu1 %v216_v11 }
  0x1e   :  { %145 = vmatpush.bf16.msra.mxu1 %v215_v12 }
  0x86   :  { %v62_v13 = vpop.f32.mrf.mxu0 }
  0x87   :  { %v63_v15 = vadd.f32 %v226_v14, %v62_v13 }
  0x89   :  { %v67_v18 = vmax.f32 %v63_v15, 0.0 }
  0x8e   :  { %v64_v16 = vpop.f32.mrf.mxu0 }
  0x8f   :  { %v65_v17 = vadd.f32 %v226_v14, %v64_v16 }
  0x91   :  { %v68_v19 = vmax.f32 %v65_v17, 0.0 }
  0x93   :  { %v69_v20 = vpack.c.bf16 %v68_v19, %v67_v18 }
  0x95   :  { %146 = vmatmul.bf16.vlgmr.msra.gmra.mxu1 %v69_v20 }
 0x112   :  { %v147_v22 = vpop.f32.mrf.mxu1 }
 0x113   :  { %v148_v23 = vadd.f32 %v227_v21, %v147_v22 }
 0x115   :  { %152 = vst.msk [vmem:[#allocation3] sm:$0xff] %vm49_vm0, %v148_v23 }
 0x11a   :  { %v149_v24 = vpop.f32.mrf.mxu1 }
 0x11b   :  { %v150_v25 = vadd.f32 %v227_v21, %v149_v24 }
 0x11d   :  { %153 = vst.msk [vmem:[#allocation3 + $0x8] sm:$0xff] %vm49_vm0, %v150_v25 }
 0x11e   :  { %166 = dma.vmem_to_hbm [thread:$0]  %s159_s0, 256, %s161_s3, [#allocation4], %s255_s24, %s255_s24, %s256_s25  }
 0x11f   :  { %252 = dma.done.wait [#allocation4], 256  }
 0x120   :  { %253 = vsyncadd [#allocation4], 4294967040 }
 0x121   :  { %171 = vsyncpa [#allocation4], 1 }

</bundles_post_ra>
